<compile_context>
chip_gen: v7x
topology: tpu7x:2x2x1
jax: 0.10.0
libtpu: 0.0.40
codegen_flags: <defaults>
</compile_context>

<pallas_src>
import functools

import jax
import jax.numpy as jnp
from jax import lax
from jax.experimental import pallas as pl
from jax.experimental.pallas import tpu as pltpu

# Explicit scoped-VMEM budget; safely below v7x's 64 MiB physical VMEM.
_VMEM_LIMIT = 48 * 1024 * 1024


# ----------------------------------------------------------------------------
# Pallas kernels
# ----------------------------------------------------------------------------
def _gates_kernel(x_ref, w_ref, b_ref, o_ref):
    """Row-tiled dense per direction: o[d] = x @ Wx[d] + b[d]."""
    o_ref[...] = (jnp.dot(x_ref[...], w_ref[...],
                          preferred_element_type=jnp.float32) + b_ref[...])


def _highway_kernel(f_ref, b_ref, xin_ref, wf_ref, wb_ref, bias_ref, o_ref):
    """Fused concat + highway gate on row tiles.

    y = [f | b]; g = sigmoid(f @ Wp[:H] + b @ Wp[H:] + bp); o = g*y + (1-g)*xin
    """
    f = f_ref[...]
    b = b_ref[...]
    g = jax.nn.sigmoid(
        jnp.dot(f, wf_ref[...], preferred_element_type=jnp.float32)
        + jnp.dot(b, wb_ref[...], preferred_element_type=jnp.float32)
        + bias_ref[...])
    y = jnp.concatenate([f, b], axis=-1)
    o_ref[...] = g * y + (1.0 - g) * xin_ref[...]


def _bilstm_rec_kernel(gxf_ref, gxb_ref, mf_ref, mb_ref, init_ref, wh_ref,
                       outf_ref, outb_ref, hn_ref, cn_ref,
                       *, chunk, batch, hidden):
    """T-chunked fused fwd+bwd MyLSTMCell recurrence (interleaved in one loop).

    gxf_ref / gxb_ref : (Tc, B, 3H) precomputed x @ Wx + b for the fwd chunk k
                        and the bwd chunk (nk-1-k)
    mf_ref / mb_ref   : (Tc, B, 1) masks for the same chunks
    init_ref          : (2, 2, H)  [dir][h0/c0]
    wh_ref            : (2, H, 3H) hidden weights (eval-mode dropout folded in)
    outf_ref/outb_ref : (Tc, B, H) per-direction hidden outputs (lane-dense)
    hn_ref / cn_ref   : (2, B, H)  resident across chunks; used as the h/c carry
    """
    Tc, B, H = chunk, batch, hidden
    k = pl.program_id(0)

    @pl.when(k == 0)
    def _():
        hn_ref[0] = jnp.broadcast_to(init_ref[0, 0:1, :], (B, H))
        cn_ref[0] = jnp.broadcast_to(init_ref[0, 1:2, :], (B, H))
        hn_ref[1] = jnp.broadcast_to(init_ref[1, 0:1, :], (B, H))
        cn_ref[1] = jnp.broadcast_to(init_ref[1, 1:2, :], (B, H))

    whf = wh_ref[0]
    whb = wh_ref[1]

    def cell(g, m, h, c, wh):
        g = g + jnp.dot(h, wh, preferred_element_type=jnp.float32)
        i = jax.nn.sigmoid(g[:, 0:H])
        j = g[:, H:2 * H]
        o = g[:, 2 * H:3 * H]
        c = m * ((1.0 - i) * c + i * jnp.tanh(j))
        h = m * (jnp.tanh(c) * jax.nn.sigmoid(o))
        return h, c

    def body(t, carry):
        hf, cf, hb, cb = carry
        s = Tc - 1 - t
        # Two independent dependency chains per iteration -> ILP on one core.
        hf, cf = cell(gxf_ref[t], mf_ref[t], hf, cf, whf)
        hb, cb = cell(gxb_ref[s], mb_ref[s], hb, cb, whb)
        outf_ref[t] = hf
        outb_ref[s] = hb
        return (hf, cf, hb, cb)

    carry0 = (hn_ref[0], cn_ref[0], hn_ref[1], cn_ref[1])
    hf, cf, hb, cb = lax.fori_loop(0, Tc, body, carry0, unroll=2)

    hn_ref[0] = hf
    cn_ref[0] = cf
    hn_ref[1] = hb
    cn_ref[1] = cb


# ----------------------------------------------------------------------------
# pallas_call wrappers
# ----------------------------------------------------------------------------
def _run_gates(x2d, wx, b, tile_rows=512):
    """x2d (N, D), wx (2, D, 3H), b (2, 1, 3H) -> gx (2, N, 3H) (dir-major)."""
    N, D = x2d.shape
    C = wx.shape[-1]
    tm = N if N <= tile_rows else tile_rows
    return pl.pallas_call(
        _gates_kernel,
        out_shape=jax.ShapeDtypeStruct((2, N, C), jnp.float32),
        grid=(2, pl.cdiv(N, tm)),
        in_specs=[pl.BlockSpec((tm, D), lambda d, i: (i, 0)),
                  pl.BlockSpec((None, D, C), lambda d, i: (d, 0, 0)),
                  pl.BlockSpec((None, 1, C), lambda d, i: (d, 0, 0))],
        out_specs=pl.BlockSpec((None, tm, C), lambda d, i: (d, i, 0)),
        compiler_params=pltpu.CompilerParams(
            dimension_semantics=("parallel", "parallel"),
            vmem_limit_bytes=_VMEM_LIMIT),
    )(x2d, wx, b)


def _run_highway(f2d, b2d, xin2d, wp, bp, tile_rows=512):
    """Fused concat + highway: f2d/b2d (N,H), xin2d (N,2H) -> (N,2H)."""
    N, H = f2d.shape
    C = xin2d.shape[-1]
    tm = N if N <= tile_rows else tile_rows
    return pl.pallas_call(
        _highway_kernel,
        out_shape=jax.ShapeDtypeStruct((N, C), jnp.float32),
        grid=(pl.cdiv(N, tm),),
        in_specs=[pl.BlockSpec((tm, H), lambda i: (i, 0)),
                  pl.BlockSpec((tm, H), lambda i: (i, 0)),
                  pl.BlockSpec((tm, C), lambda i: (i, 0)),
                  pl.BlockSpec((H, C), lambda i: (0, 0)),
                  pl.BlockSpec((H, C), lambda i: (0, 0)),
                  pl.BlockSpec((1, C), lambda i: (0, 0))],
        out_specs=pl.BlockSpec((tm, C), lambda i: (i, 0)),
        compiler_params=pltpu.CompilerParams(
            dimension_semantics=("parallel",),
            vmem_limit_bytes=_VMEM_LIMIT),
    )(f2d, b2d, xin2d, wp[:H], wp[H:], bp)


def _pick_chunk(T, B, H, target_bytes=2 * 1024 * 1024):
    """Largest divisor of T whose per-direction gx chunk is ~target_bytes."""
    per_t = max(1, B * 3 * H * 4)
    tc = int(max(1, min(T, target_bytes // per_t)))
    while T % tc != 0:
        tc -= 1
    return tc


def _run_bilstm_layer(gx, masks, init, wh):
    """gx (2,T,B,3H) dir-major; masks (T,B,1); init (2,2,H); wh (2,H,3H)."""
    _, T, B, _ = gx.shape
    H = wh.shape[1]
    Tc = _pick_chunk(T, B, H)
    nk = T // Tc
    kernel = functools.partial(_bilstm_rec_kernel, chunk=Tc, batch=B, hidden=H)
    out_f, out_b, hn, cn = pl.pallas_call(
        kernel,
        out_shape=(jax.ShapeDtypeStruct((T, B, H), jnp.float32),
                   jax.ShapeDtypeStruct((T, B, H), jnp.float32),
                   jax.ShapeDtypeStruct((2, B, H), jnp.float32),
                   jax.ShapeDtypeStruct((2, B, H), jnp.float32)),
        grid=(nk,),
        in_specs=[
            # fwd direction walks chunks 0..nk-1, bwd walks nk-1..0
            pl.BlockSpec((None, Tc, B, 3 * H), lambda k: (0, k, 0, 0)),
            pl.BlockSpec((None, Tc, B, 3 * H), lambda k: (1, nk - 1 - k, 0, 0)),
            pl.BlockSpec((Tc, B, 1), lambda k: (k, 0, 0)),
            pl.BlockSpec((Tc, B, 1), lambda k: (nk - 1 - k, 0, 0)),
            pl.BlockSpec((2, 2, H), lambda k: (0, 0, 0)),
            pl.BlockSpec((2, H, 3 * H), lambda k: (0, 0, 0)),
        ],
        out_specs=(
            pl.BlockSpec((Tc, B, H), lambda k: (k, 0, 0)),
            pl.BlockSpec((Tc, B, H), lambda k: (nk - 1 - k, 0, 0)),
            pl.BlockSpec((2, B, H), lambda k: (0, 0, 0)),   # resident carry
            pl.BlockSpec((2, B, H), lambda k: (0, 0, 0)),   # resident carry
        ),
        compiler_params=pltpu.CompilerParams(
            dimension_semantics=("arbitrary",),
            vmem_limit_bytes=_VMEM_LIMIT),
    )(gx, gx, masks, masks, init, wh)
    return out_f, out_b, hn, cn


# ----------------------------------------------------------------------------
# Full Highway_Concat_BiLSTM forward (glue in plain JAX)
# ----------------------------------------------------------------------------
def highway_concat_bilstm(x, masks, params, hidden_size, num_layers,
                          dropout_out=0.0):
    """Returns (output, (h_n, c_n), outputs) matching the torch module (eval
    mode, batch_first=False, bidirectional=True)."""
    hidden_keep = 1.0 - dropout_out
    H = hidden_size
    T, B, _ = x.shape
    layer_in = x
    h_n, c_n, outputs = [], [], []
    out = layer_in
    for layer in range(num_layers):
        p = params[layer]
        D = layer_in.shape[-1]

        # One-time weight transforms (outside the serial recurrence).
        wx = jnp.stack([p['f_wx'], p['b_wx']], axis=0)                  # (2,D,3H)
        bias = jnp.stack([p['f_b'], p['b_b']], axis=0)                  # (2,1,3H)
        wh = hidden_keep * jnp.stack([p['f_wh'], p['b_wh']], axis=0)    # (2,H,3H)
        init = jnp.stack([p['f_init'], p['b_init']], axis=0)            # (2,2,H)

        # Hoisted non-recurrent projection, direction-major output.
        gx = _run_gates(layer_in.reshape(T * B, D), wx, bias)
        gx = gx.reshape(2, T, B, 3 * H)

        out_f, out_b, hn, cn = _run_bilstm_layer(gx, masks, init, wh)
        h_n += [hn[0], hn[1]]
        c_n += [cn[0], cn[1]]

        # F.dropout(output, p, training=False) is identity in eval mode.
        if layer > 0:
            out = _run_highway(out_f.reshape(T * B, H),
                               out_b.reshape(T * B, H),
                               layer_in.reshape(T * B, 2 * H),
                               p['proj_w'], p['proj_b']).reshape(T, B, 2 * H)
        else:
            out = jnp.concatenate([out_f, out_b], axis=-1)
        outputs.append(out)
        layer_in = out

    return out, (jnp.stack(h_n, 0), jnp.stack(c_n, 0)), outputs


# ----------------------------------------------------------------------------
# Pure-JAX reference (for correctness checking only)
# ----------------------------------------------------------------------------
def _ref_dir(x, masks, h0, c0, wx, wh, b, hidden_keep, reverse):
    H = h0.shape[-1]

    def step(carry, inp):
        h, c = carry
        xt, mt = inp
        hd = h * hidden_keep
        g = xt @ wx + hd @ wh + b
        i = jax.nn.sigmoid(g[:, :H])
        j = g[:, H:2 * H]
        o = g[:, 2 * H:]
        cn = mt * ((1.0 - i) * c + i * jnp.tanh(j))
        hn = mt * (jnp.tanh(cn) * jax.nn.sigmoid(o))
        return (hn, cn), hn

    (hT, cT), ys = jax.lax.scan(step, (h0, c0), (x, masks), reverse=reverse)
    return ys, hT, cT


def reference_forward(x, masks, params, num_layers, dropout_out=0.0):
    hidden_keep = 1.0 - dropout_out
    T, B, _ = x.shape
    layer_in = x
    h_n, c_n = [], []
    out = layer_in
    for layer in range(num_layers):
        p = params[layer]
        f_h0 = jnp.tile(p['f_init'][0][None, :], (B, 1))
        f_c0 = jnp.tile(p['f_init'][1][None, :], (B, 1))
        b_h0 = jnp.tile(p['b_init'][0][None, :], (B, 1))
        b_c0 = jnp.tile(p['b_init'][1][None, :], (B, 1))
        fo, fh, fc = _ref_dir(layer_in, masks, f_h0, f_c0,
                              p['f_wx'], p['f_wh'], p['f_b'], hidden_keep, False)
        bo, bh, bc = _ref_dir(layer_in, masks, b_h0, b_c0,
                              p['b_wx'], p['b_wh'], p['b_b'], hidden_keep, True)
        h_n += [fh, bh]
        c_n += [fc, bc]
        out = jnp.concatenate([fo, bo], axis=2)
        if layer > 0:
            g = jax.nn.sigmoid(out @ p['proj_w'] + p['proj_b'])
            out = g * out + (1.0 - g) * layer_in
        layer_in = out
    return out, (jnp.stack(h_n, 0), jnp.stack(c_n, 0))


# ----------------------------------------------------------------------------
# Deterministic parameter init (shapes follow the module's __init__)
# ----------------------------------------------------------------------------
def init_params(key, input_size, hidden_size, num_layers):
    H = hidden_size
    params = []
    for layer in range(num_layers):
        din = input_size if layer == 0 else 2 * H
        key, *ks = jax.random.split(key, 9)
        p = {
            'f_wx': jax.random.normal(ks[0], (din, 3 * H), jnp.float32) * 0.1,
            'f_wh': jax.random.normal(ks[1], (H, 3 * H), jnp.float32) * 0.1,
            'f_b': jnp.zeros((1, 3 * H), jnp.float32),        # cell bias init to 0
            'b_wx': jax.random.normal(ks[2], (din, 3 * H), jnp.float32) * 0.1,
            'b_wh': jax.random.normal(ks[3], (H, 3 * H), jnp.float32) * 0.1,
            'b_b': jnp.zeros((1, 3 * H), jnp.float32),
            'f_init': jax.random.normal(ks[4], (2, H), jnp.float32) * 0.1,
            'b_init': jax.random.normal(ks[5], (2, H), jnp.float32) * 0.1,
        }
        if layer > 0:
            p['proj_w'] = jax.random.normal(ks[6], (2 * H, 2 * H), jnp.float32) * 0.1
            p['proj_b'] = jax.random.normal(ks[7], (1, 2 * H), jnp.float32) * 0.1
        params.append(p)
    return params


# ----------------------------------------------------------------------------
if __name__ == "__main__":
    T, B, D, H, L = 8, 2, 16, 32, 2
    dropout_out = 0.0

    key = jax.random.PRNGKey(0)
    kx, kp = jax.random.split(key)
    x = jax.random.normal(kx, (T, B, D), jnp.float32)

    # variable-length sequences -> padding mask
    lengths = jnp.array([T, T - 3])
    masks = (jnp.arange(T)[:, None] < lengths[None, :]).astype(jnp.float32)[:, :, None]

    params = init_params(kp, D, H, L)

    out, (h_n, c_n), outputs = highway_concat_bilstm(
        x, masks, params, H, L, dropout_out=dropout_out)
    jax.block_until_ready(out)

    assert out.shape == (T, B, 2 * H)
    assert h_n.shape == (2 * L, B, H) and c_n.shape == (2 * L, B, H)
    assert len(outputs) == L

    ref_out, (ref_h, ref_c) = reference_forward(x, masks, params, L, dropout_out)
    assert jnp.allclose(out, ref_out, atol=1e-4, rtol=1e-4)
    assert jnp.allclose(h_n, ref_h, atol=1e-4, rtol=1e-4)
    assert jnp.allclose(c_n, ref_c, atol=1e-4, rtol=1e-4)

    print("KERNEL_OK")
</pallas_src>

<mosaic_0001>
module attributes {stable_mosaic.version = 11 : i64} {
  func.func @_gates_kernel(%arg0: i32, %arg1: i32, %arg2: memref<16x16xf32, #tpu.memory_space<vmem>>, %arg3: memref<1x16x96xf32, #tpu.memory_space<vmem>>, %arg4: memref<1x1x96xf32, #tpu.memory_space<vmem>>, %arg5: memref<1x16x96xf32, #tpu.memory_space<vmem>>) attributes {dimension_semantics = [#tpu.dimension_semantics<parallel>, #tpu.dimension_semantics<parallel>], iteration_bounds = array<i64: 2, 1>, scalar_prefetch = 0 : i64, scratch_operands = 0 : i64, tpu.core_type = #tpu.core_type<tc>, window_params = [{transform_indices = @transform_0, window_bounds = array<i64: 16, 16>}, {transform_indices = @transform_1, window_bounds = array<i64: 1, 16, 96>}, {transform_indices = @transform_2, window_bounds = array<i64: 1, 1, 96>}, {transform_indices = @transform_3, window_bounds = array<i64: 1, 16, 96>}]} {
    %c0 = arith.constant 0 : index
    %c0_0 = arith.constant 0 : index
    %0 = vector.load %arg2[%c0, %c0_0] : memref<16x16xf32, #tpu.memory_space<vmem>>, vector<16x16xf32>
    %c0_1 = arith.constant 0 : index
    %c0_2 = arith.constant 0 : index
    %c0_3 = arith.constant 0 : index
    %1 = vector.load %arg3[%c0_1, %c0_2, %c0_3] : memref<1x16x96xf32, #tpu.memory_space<vmem>>, vector<1x16x96xf32>
    %2 = vector.shape_cast %1 : vector<1x16x96xf32> to vector<16x96xf32>
    %cst = arith.constant dense<0.000000e+00> : vector<16x96xf32>
    %3 = tpu.matmul %0, %2, %cst {dimension_numbers = #tpu.dot_dimension_numbers<[1], [0], [0], [1], [0, 0, 1, 1], [], []>} : vector<16x16xf32>, vector<16x96xf32>, vector<16x96xf32> -> vector<16x96xf32>
    %c0_4 = arith.constant 0 : index
    %c0_5 = arith.constant 0 : index
    %c0_6 = arith.constant 0 : index
    %4 = vector.load %arg4[%c0_4, %c0_5, %c0_6] : memref<1x1x96xf32, #tpu.memory_space<vmem>>, vector<1x1x96xf32>
    %5 = vector.shape_cast %4 : vector<1x1x96xf32> to vector<1x96xf32>
    %6 = vector.broadcast %5 : vector<1x96xf32> to vector<16x96xf32>
    %7 = arith.addf %3, %6 : vector<16x96xf32>
    %c0_7 = arith.constant 0 : index
    %c0_8 = arith.constant 0 : index
    %c0_9 = arith.constant 0 : index
    %8 = vector.load %arg5[%c0_7, %c0_8, %c0_9] : memref<1x16x96xf32, #tpu.memory_space<vmem>>, vector<1x16x96xf32>
    %9 = vector.shape_cast %8 : vector<1x16x96xf32> to vector<16x96xf32>
    %10 = vector.shape_cast %7 : vector<16x96xf32> to vector<1x16x96xf32>
    tpu.vector_store %arg5[%c0_7, %c0_8, %c0_9], %10 {strides = array<i32>} : memref<1x16x96xf32, #tpu.memory_space<vmem>>, vector<1x16x96xf32>,
    return
  }
  func.func @transform_0(%arg0: i32, %arg1: i32) -> (i32, i32) {
    %c0_i32 = arith.constant 0 : i32
    %c0_i32_0 = arith.constant 0 : i32
    return %arg1, %c0_i32 : i32, i32
  }
  func.func @transform_1(%arg0: i32, %arg1: i32) -> (i32, i32, i32) {
    %c0_i32 = arith.constant 0 : i32
    %c0_i32_0 = arith.constant 0 : i32
    %c0_i32_1 = arith.constant 0 : i32
    return %arg0, %c0_i32, %c0_i32_0 : i32, i32, i32
  }
  func.func @transform_2(%arg0: i32, %arg1: i32) -> (i32, i32, i32) {
    %c0_i32 = arith.constant 0 : i32
    %c0_i32_0 = arith.constant 0 : i32
    %c0_i32_1 = arith.constant 0 : i32
    return %arg0, %c0_i32, %c0_i32_0 : i32, i32, i32
  }
  func.func @transform_3(%arg0: i32, %arg1: i32) -> (i32, i32, i32) {
    %c0_i32 = arith.constant 0 : i32
    %c0_i32_0 = arith.constant 0 : i32
    return %arg0, %arg1, %c0_i32 : i32, i32, i32
  }
}

</mosaic_0001>

<bundles_post_ra>
// kernel: tpu_custom_call.1
= control target key start
LH: loop header
LB: loop body
LE: loop exit
PB: predicated region body
PF: predicated region fallthrough
CT: control target
= control target key end

     0   :  { %8 = vsyncpa [#allocation3], 0  ;;  %s978_s0 = inlined_call_operand.hbm [shape: f32[16,16], index: 0, kind: input, shape index: {}]   ;;  %s979_s1 = inlined_call_operand.hbm [shape: f32[2,16,96], index: 1, kind: input, shape index: {}]   ;;  %s980_s2 = inlined_call_operand.vmem [shape: f32[2,1,96], index: 2, kind: input, shape index: {}]   ;;  %s981_s3 = inlined_call_operand.hbm [shape: f32[2,16,96], index: 3, kind: output, shape index: {}]  }
   0x1   :  { %9 = vsyncpa [#allocation6], 0 }
   0x2   :  { %11 = vsyncpa [#allocation6 + $0x1], 0 }
   0x3   :  { %12 = vsyncpa [#allocation4], 0 }
   0x4   :  { %14 = vsyncpa [#allocation4 + $0x1], 0  ;;  %s748_s12 = smov 0   ;;  %s750_s13 = smov 0  }
   0x5   :  { %s752_s14 = smov 0   ;;  %s754_s15 = smov 0  }
   0x6   :  { %s756_s16 = smov 0   ;;  %s758_s17 = smov 0  }
   0x7 LB: > { %s461_s18 = sadd.s32 4294967295, %s719_s17   ;;  %s462_s19 = sadd.s32 4294967294, %s719_s17   ;;  %s719_s17 = sphi %s758_s17, %s20_s17   ;;  %s715_s16 = sphi %s756_s16, %s1005_s16   ;;  %s711_s15 = sphi %s754_s15, %s1004_s15   ;;  %s707_s14 = sphi %s752_s14, %s1003_s14   ;;  %s703_s13 = sphi %s750_s13, %s1002_s13   ;;  %s699_s12 = sphi %s748_s12, %s1001_s12  }
   0x8   : > { %p78_p0 = scmp.ne.s32.totalorder %s703_s13, %s699_s12  ;;  %p782_p1 = scmp.eq.s32.totalorder %s461_s18, 0 }
   0x9   : > { %p786_p2 = scmp.eq.s32.totalorder %s461_s18, 1  ;;  %p136_p3 = scmp.eq.s32.totalorder %s462_s19, 1 }
   0xa   : > { %s986_s20 = scalar_select %p782_p1, 1, 0 }
   0xb   : > { %s987_s21 = scalar_select %p786_p2, 1, 0 }
   0xc   : > { %p792_p4 = por %p782_p1, %p78_p0  ;;  %p463_p5 = scmp.ge.s32.totalorder %s719_s17, 1 }
   0xd   : > { %p797_p6 = por %p136_p3, %p78_p0  ;;  %p143_p7 = scmp.lt.s32.totalorder %s719_s17, 3 }
   0xe   : > { %s988_s22 = scalar_select %p792_p4, 1, 0 }
   0xf   : > { %s989_s23 = scalar_select %p797_p6, 1, 0 }
  0x10   : > { %p802_p8 = pnand %p463_p5, %p143_p7  ;;  %s721_s25 = smov [#allocation2]  }
  0x11   : > { %s158_s26 = sshll.u32 %s721_s25, 4  ;;  %s32_s28 = sadd.s32 1, %s715_s16  ;;  %s159_s26 = int_to_ptr.vmem [resolvable:$true] %s158_s26 }
  0x12   : > { %s990_s24 = scalar_select %p802_p8, 1, 0 }
  0x13   : > { %p506_p9 = pneg %p802_p8  ;;  %s575_s4 = scalar_lea.hbm %s978_s0, 256 }
  0x14   : > { %p576_p12 = scmp.ne.s32.totalorder %s978_s0, %s575_s4  ;;  %p582_p5 = scmp.lt.u32.totalorder %s575_s4, %s978_s0 }
  0x15   : > { %p811_p11 = pnand %p506_p9, %p782_p1 }
  0x17   : > { %p577_p13 = pneg %p811_p11 }
  0x19   : > { %p578_p0 = pnand %p577_p13, %p576_p12 }
  0x1b   : > { %p579_p3 = pneg %p578_p0 }
  0x1d   : > { %p584_p7 = pnand %p582_p5, %p579_p3 }
  0x1f   : > { %587 = shalt.err (!%p584_p7)
}
  0x20   : > { %s588_s9 = scalar_lea.vmem %s159_s26, 256  ;;  %p596_p4 = scmp.lt.s32.totalorder %s159_s26, %s159_s26 }
  0x21   : > { %p589_p9 = scmp.ne.s32.totalorder %s159_s26, %s588_s9  ;;  %p597_p1 = scmp.lt.s32.totalorder %s588_s9, %s588_s9 }
  0x23   : > { %p591_p10 = pnand %p589_p9, %p577_p13  ;;  %p598_p8 = por %p597_p1, %p596_p4 }
  0x25   : > { %p592_p6 = pneg %p591_p10 }
  0x27   : > { %p599_p2 = pnand %p598_p8, %p592_p6 }
  0x29   : > { %602 = shalt.err (!%p599_p2)
}
  0x2a   : > { %s722_s10 = smov 128   ;;  %s723_s11 = smov 8  }
  0x2b   : > { %509 = dma.hbm_to_vmem [thread:$0]  (!%p811_p11), %s978_s0, 256, %s159_s26, [#allocation3], %s722_s10, %s722_s10, %s723_s11  }
  0x2c   : > { %p34_p1 = scmp.ge.s32.totalorder %s32_s28, 2  ;;  %s65_s25 = sadd.s32 1, %s707_s14 }
  0x2d   : > { %p72_p2 = scmp.ne.s32.totalorder %s707_s14, %s703_s13  ;;  %p73_p4 = scmp.eq.s32.totalorder %s719_s17, 0 }
  0x2e   : > { %s1007_s28 = smov (%p34_p1, %s32_s28), 0  ;;  %p993_p8 = scmp.ne.s32.totalorder %s987_s21, 0 }
  0x2f   : > { %p841_p6 = por %p73_p4, %p72_p2  ;;  %s62_s30 = ssub.s32 %s715_s16, %s1007_s28 }
  0x30   : > { %p847_p10 = por %p993_p8, %p72_p2  ;;  %p519_p12 = scmp.lt.s32.totalorder %s719_s17, 2 }
  0x31   : > { %p63_p11 = scmp.eq.s32.totalorder %s62_s30, 0  ;;  %s172_s26 = sand.u32 1, %s707_s14  }
  0x32   : > { %s466_s4 = sshll.u32 %s172_s26, 4  ;;  %s481_s6 = sshll.u32 %s715_s16, 8 }
  0x33   : > { %s856_s5 = scalar_select %p63_p11, %s707_s14, %s65_s25  }
  0x34   : > { %s862_s9 = scalar_lea.hbm %s979_s1, %s481_s6  ;;  %s176_s21 = scalar_lea.vmem [#allocation5], %s466_s4 }
  0x35   : > { %s183_s18 = sshll.u32 %s176_s21, 4  ;;  %p868_p13 = pnand %p519_p12, %p841_p6  ;;  %s864_s18 = int_to_ptr.vmem [resolvable:$true] %s183_s18 }
  0x36   : > { %s872_s25 = scalar_lea.sflag [#allocation6], %s172_s26  ;;  %s603_s30 = scalar_lea.hbm %s862_s9, 256 }
  0x37   : > { %p604_p0 = scmp.ne.s32.totalorder %s862_s9, %s603_s30  ;;  %p605_p3 = pneg %p868_p13 }
  0x38   : > { %s608_s29 = scalar_lea.hbm %s979_s1, 512  ;;  %p609_p9 = scmp.lt.u32.totalorder %s862_s9, %s979_s1 }
  0x39   : > { %p606_p5 = pnand %p605_p3, %p604_p0  ;;  %p610_p1 = scmp.lt.u32.totalorder %s608_s29, %s603_s30 }
  0x3a   : > { %p612_p4 = scmp.lt.u32.totalorder %s603_s30, %s862_s9 }
  0x3b   : > { %p607_p7 = pneg %p606_p5  ;;  %p611_p2 = por %p610_p1, %p609_p9 }
  0x3d   : > { %p613_p6 = por %p612_p4, %p611_p2 }
  0x3f   : > { %p614_p8 = pnand %p613_p6, %p607_p7 }
  0x41   : > { %617 = shalt.err (!%p614_p8)
}
  0x42   : > { %s618_s26 = scalar_lea.vmem %s864_s18, 256  ;;  %s724_s21 = smov [#allocation5]  }
  0x43   : > { %p619_p12 = scmp.ne.s32.totalorder %s864_s18, %s618_s26  ;;  %s623_s4 = sshll.u32 %s724_s21, 4  ;;  %s624_s4 = int_to_ptr.vmem [resolvable:$false] %s623_s4 }
  0x44   : > { %s625_s6 = scalar_lea.vmem %s624_s4, 512  ;;  %p626_p5 = scmp.lt.s32.totalorder %s864_s18, %s624_s4 }
  0x45   : > { %p621_p11 = pnand %p619_p12, %p605_p3  ;;  %p627_p9 = scmp.lt.s32.totalorder %s625_s6, %s618_s26 }
  0x47   : > { %p622_p0 = pneg %p621_p11  ;;  %p628_p1 = por %p627_p9, %p626_p5 }
  0x49   : > { %p629_p2 = pnand %p628_p1, %p622_p0 }
  0x4b   : > { %632 = shalt.err (!%p629_p2)
}
  0x4c   : > { %513 = dma.hbm_to_vmem [thread:$0]  (!%p868_p13), %s862_s9, 256, %s864_s18, %s872_s25, %s722_s10, %s722_s10, %s723_s11  }
  0x4d   : > { %p996_p3 = scmp.ne.s32.totalorder %s990_s24, 0 }
  0x4e   : > { %p997_p7 = scmp.ne.s32.totalorder (!%p996_p3), %s986_s20, 0 }
  0x4f   : > { %201 = sbr.rel (%p996_p3) target bundleno = 328 (0x148), region = 32 }
  0x56   : > { %686 = dma.done.wait (%p997_p7), [#allocation3], 256  }
  0x57   : > { %688 = vsyncadd (%p997_p7), [#allocation3], 4294967040  ;;  %s910_s30 = sand.u32 1, %s703_s13   ;;  %p998_p4 = scmp.ne.s32.totalorder %s988_s22, 0 }
  0x58   : > { %s471_s19 = sshll.u32 %s910_s30, 4  ;;  %s208_s29 = scalar_lea.sflag [#allocation6], %s910_s30 }
  0x59   : > { %s211_s7 = scalar_lea.vmem [#allocation5], %s471_s19 }
  0x5a   : > { %690 = dma.done.wait (%p998_p4), %s208_s29, 256  }
  0x5b   : > { %692 = vsyncadd (%p998_p4), %s208_s29, 4294967040  ;;  %vm253_vm0 = vcmask 130048   ;;  %v244_v0 = vld [vmem:[%s211_s7] sm:$0xff]  ;;  %v245_v1 = vld [vmem:[%s211_s7 + $0x8] sm:$0xff]  ;;  %p238_p13 = scmp.lt.s32.totalorder %s711_s15, 1  ;;  %s236_s11 = scalar_lea.vmem [#allocation7], %s471_s19 }
  0x5c   : > { %v242_v2 = vld [vmem:[#allocation2] sm:$0xff]  ;;  %v494_v3 = vpack.c.bf16 %v245_v1, %v244_v0  ;;  %v243_v4 = vld [vmem:[#allocation2 + $0x8] sm:$0xff]  ;;  %s354_s9 = sshll.u32 %s236_s11, 4  ;;  %s482_s18 = sshll.u32 %s711_s15, 8  ;;  %vm335_vm1 = vcmask 785408   ;;  %s924_s9 = int_to_ptr.vmem [resolvable:$true] %s354_s9 }
  0x5d   : > { %491 = vmatprep.mubr.msk.f32.mxu0 %vm253_vm0, %v242_v2  ;;  %s239_s20 = scalar_select %p238_p13, %s711_s15, 1 }
  0x5e   : > { %495 = vmatprep.subr.bf16.mxu0 %v494_v3  ;;  %s929_s26 = scalar_lea.hbm %s981_s3, %s482_s18  ;;  %s339_s21 = scalar_lea.sflag [#allocation4], %s910_s30 }
  0x5f   : > { %497 = vmatpush3.bf16.msra.mxu0 %v494_v3  ;;  %s240_s22 = scalar_lea.vmem %s980_s2, %s239_s20  ;;  %s633_s4 = scalar_lea.vmem %s924_s9, 256 }
  0x60   : > { %v473_v5 = vld [vmem:[%s240_s22] ss:$0 sm:$0xff]  ;;  %p634_p6 = scmp.ne.s32.totalorder %s924_s9, %s633_s4  ;;  %s725_s15 = smov [#allocation7]  }
  0x61   : > { %s637_s6 = sshll.u32 %s725_s15, 4  ;;  %s638_s6 = int_to_ptr.vmem [resolvable:$false] %s637_s6 }
  0x62   : > { %492 = vmatmul.mubr.msk.f32.vlgmr.msra.gmra.mrb[0].mxu0 %vm253_vm0, %v243_v4  ;;  %p635_p8 = pnand %p634_p6, %p847_p10  ;;  %s639_s19 = scalar_lea.vmem %s638_s6, 512 }
  0x63   : > { %p640_p11 = scmp.lt.s32.totalorder %s924_s9, %s638_s6  ;;  %p641_p0 = scmp.lt.s32.totalorder %s639_s19, %s633_s4 }
  0x64   : > { %p636_p12 = pneg %p635_p8 }
  0x65   : > { %p642_p5 = por %p641_p0, %p640_p11 }
  0x67   : > { %p643_p9 = pnand %p642_p5, %p636_p12 }
 0x135   : > { %v493_v6 = vpop.f32.mrb[0].mxu0 }
 0x136   : > { %v332_v7 = vadd.f32 %v493_v6, %v473_v5  ;;  %v326_v8 = vpop.f32.mrb[1].mxu0 }
 0x137   : > { %v327_v9 = vadd.f32 %v473_v5, %v326_v8 }
 0x138   : > { %337 = vst.msk [vmem:[%s236_s11 + $0x8] sm:$0xff] %vm335_vm1, %v332_v7 }
 0x139   : > { %336 = vst.msk [vmem:[%s236_s11] sm:$0xff] %vm335_vm1, %v327_v9 }
 0x13a   : > { %646 = shalt.err (!%p643_p9)
}
 0x13b   : > { %s647_s29 = scalar_lea.hbm %s929_s26, 256  ;;  %s651_s24 = scalar_lea.hbm %s981_s3, 512 }
 0x13c   : > { %p648_p1 = scmp.ne.s32.totalorder %s929_s26, %s647_s29  ;;  %p652_p7 = scmp.lt.u32.totalorder %s929_s26, %s981_s3 }
 0x13d   : > { %p653_p4 = scmp.lt.u32.totalorder %s651_s24, %s647_s29  ;;  %p655_p6 = scmp.lt.u32.totalorder %s647_s29, %s929_s26 }
 0x13e   : > { %p649_p2 = pnand %p648_p1, %p847_p10 }
 0x13f   : > { %p654_p13 = por %p653_p4, %p652_p7 }
 0x140   : > { %p650_p3 = pneg %p649_p2 }
 0x141   : > { %p656_p8 = por %p655_p6, %p654_p13 }
 0x143   : > { %p657_p12 = pnand %p656_p8, %p650_p3 }
 0x145   : > { %660 = shalt.err (!%p657_p12)
}
 0x146   : > { %s726_s11 = smov 128   ;;  %s727_s18 = smov 8  }
 0x147   : > { %504 = dma.vmem_to_hbm [thread:$0]  (%p847_p10), %s924_s9, 256, %s929_s26, %s339_s21, %s726_s11, %s726_s11, %s727_s18  }
 0x148 PF: > { %s369_s25 = sand.u32 1, %s699_s12   ;;  %p999_p11 = scmp.ne.s32.totalorder %s989_s23, 0 }
 0x149   : > { %p1000_p0 = scmp.ge.s32.totalorder %s719_s17, 2  ;;  %s370_s8 = scalar_lea.sflag [#allocation4], %s369_s25 }
 0x14b   : > { %p515_p5 = pnand %p1000_p0, %p999_p11 }
 0x14d   : > { %694 = dma.done.wait (!%p515_p5), %s370_s8, 256  }
 0x14e   : > { %696 = vsyncadd (!%p515_p5), %s370_s8, 4294967040  ;;  %s20_s17 = sadd.s32 1, %s719_s17   ;;  %s1001_s12 = smov %s703_s13 }
 0x14f   : > { %p17_p9 = scmp.ge.s32.totalorder %s20_s17, 4   ;;  %s1002_s13 = smov %s707_s14 }
 0x150   : > { %s1003_s14 = smov %s856_s5  ;;  %s1004_s15 = smov %s715_s16 }
 0x151   : > { %s1005_s16 = smov %s1007_s28  ;;  %19 = sbr.rel (!%p17_p9) target bundleno = 7 (0x7), region = 86 }
 0x158   :  { %375 = vsyncpa [#allocation3], 1 }
 0x159   :  { %377 = vsyncpa [#allocation3 + $0x1], 1 }
 0x15a   :  { %378 = vsyncpa [#allocation6], 1 }
 0x15b   :  { %380 = vsyncpa [#allocation6 + $0x1], 1 }
 0x15c   :  { %381 = vsyncpa [#allocation4], 1 }
 0x15d   :  { %383 = vsyncpa [#allocation4 + $0x1], 1 }

</bundles_post_ra>
